<compile_context>
chip_gen: v5e
topology: v5e:2x2
jax: 0.10.0
libtpu: 0.0.40
codegen_flags: <defaults>
</compile_context>

<pallas_src>
import functools

import jax
import jax.numpy as jnp
from jax.experimental import pallas as pl
from jax.experimental.pallas import tpu as pltpu


def _round_up(a, b):
    return ((a + b - 1) // b) * b


def _rmsnorm_kernel(w_ref, x_ref, o_ref, *, eps, inv_h):
    # x_ref: (block_r, H_block) tile; w_ref: (1, H_block) resident f32 weight.
    x = x_ref[...].astype(jnp.float32)
    w = w_ref[...]  # already float32
    ms = jnp.sum(x * x, axis=-1, keepdims=True) * inv_h
    inv = jax.lax.rsqrt(ms + eps)
    o_ref[...] = (x * inv * w).astype(o_ref.dtype)


def _choose_block_r(R, H_block, dtype_bytes, packing):
    """Row-tile size: ~3 MiB per tile buffer, and >= ~8 grid steps when R allows."""
    tile_budget = 3 * 1024 * 1024  # past the roofline knee, cheap to pipeline deeply
    rows_from_budget = (tile_budget // max(1, H_block * dtype_bytes)) // packing * packing
    rows_from_budget = max(packing, min(rows_from_budget, 1024))

    target_steps = 8  # several iterations per TC on v7x (grid split across 2 cores)
    rows_for_steps = _round_up(max(1, (R + target_steps - 1) // target_steps), packing)

    return max(packing, min(rows_from_budget, rows_for_steps))


def rmsnorm_pallas(weight, x, eps=1e-6):
    """RMS-normalize `x` over its last dim and scale by `weight` (H elements)."""
    orig_shape = x.shape
    H = orig_shape[-1]
    x2 = x.reshape(-1, H)
    R = x2.shape[0]

    dtype_bytes = jnp.dtype(x.dtype).itemsize
    packing = max(8, 32 // dtype_bytes)  # sublane packing: 8 f32, 16 bf16, 32 int8

    # Only pad columns in HBM when H < 128 (lane-dense stores matter there).
    # For H >= 128 the block's last dim equals the full array dim H, which is a
    # legal block shape even when H % 128 != 0; lane padding stays in-vreg.
    if H < 128:
        H_block = 128
        x2 = jnp.pad(x2, ((0, 0), (0, H_block - H)))
    else:
        H_block = H

    # Weight stays float32 (tiny, resident block, DMA'd once).
    w2 = weight.astype(jnp.float32).reshape(1, H)
    if H_block != H:
        w2 = jnp.pad(w2, ((0, 0), (0, H_block - H)))

    block_r = _choose_block_r(R, H_block, dtype_bytes, packing)
    grid = (pl.cdiv(R, block_r),)

    # 2 in + 2 out double-buffered tiles + weight + slack; capped < v7x physical VMEM.
    tile_bytes = block_r * H_block * dtype_bytes
    vmem_needed = 4 * tile_bytes + 2 * H_block * 4
    vmem_limit = int(min(40 * 1024 * 1024, max(16 * 1024 * 1024, vmem_needed + (4 << 20))))

    cost = pl.CostEstimate(
        flops=3 * R * H,
        transcendentals=R,
        bytes_accessed=2 * R * H * dtype_bytes + H * 4,
    )

    out = pl.pallas_call(
        functools.partial(_rmsnorm_kernel, eps=float(eps), inv_h=1.0 / float(H)),
        out_shape=jax.ShapeDtypeStruct((R, H_block), x.dtype),
        grid=grid,
        in_specs=[
            pl.BlockSpec((1, H_block), lambda i: (0, 0)),          # weight: resident
            pl.BlockSpec((block_r, H_block), lambda i: (i, 0)),    # x row tiles (ragged last block OK)
        ],
        out_specs=pl.BlockSpec((block_r, H_block), lambda i: (i, 0)),
        compiler_params=pltpu.CompilerParams(
            dimension_semantics=("parallel",),
            vmem_limit_bytes=vmem_limit,
        ),
        cost_estimate=cost,
    )(w2, x2)

    if H_block != H:
        out = out[:, :H]
    return out.reshape(orig_shape)


class RMSNorm:
    """JAX mirror of the PyTorch RMSNorm module (forward only)."""

    def __init__(self, shape, eps=1e-6):
        self.eps = eps
        # Parameter initialized exactly as torch.ones(shape)
        self.weight = jnp.ones(shape, dtype=jnp.float32)

    def __call__(self, x):
        # Weight is kept f32 inside the kernel; output cast back to x.dtype.
        return rmsnorm_pallas(self.weight, x, self.eps).astype(x.dtype)


def _rmsnorm_ref(weight, x, eps):
    xf = x.astype(jnp.float32)
    ms = jnp.mean(xf * xf, axis=-1, keepdims=True)
    return (xf * jax.lax.rsqrt(ms + eps) * weight.astype(jnp.float32)).astype(x.dtype)


if __name__ == "__main__":
    key = jax.random.PRNGKey(0)
    batch, seq, hidden = 2, 8, 32

    x = jax.random.normal(key, (batch, seq, hidden), dtype=jnp.float32)

    layer = RMSNorm(hidden, eps=1e-6)

    out = layer(x)
    out = jax.block_until_ready(out)

    ref = _rmsnorm_ref(layer.weight, x, layer.eps)
    assert out.shape == x.shape and out.dtype == x.dtype
    assert jnp.allclose(out, ref, atol=1e-5, rtol=1e-5)

    print("KERNEL_OK")
</pallas_src>

<mosaic_0001>
module attributes {stable_mosaic.version = 11 : i64} {
  func.func @_rmsnorm_kernel(%arg0: i32, %arg1: memref<1x128xf32, #tpu.memory_space<vmem>>, %arg2: memref<8x128xf32, #tpu.memory_space<vmem>>, %arg3: memref<8x128xf32, #tpu.memory_space<vmem>>) attributes {dimension_semantics = [#tpu.dimension_semantics<parallel>], iteration_bounds = array<i64: 2>, scalar_prefetch = 0 : i64, scratch_operands = 0 : i64, tpu.core_type = #tpu.core_type<tc>, window_params = [{pipeline_mode = #tpu.pipeline_mode<synchronous>, transform_indices = @transform_0, window_bounds = array<i64: 1, 128>}, {transform_indices = @transform_1, window_bounds = array<i64: 8, 128>}, {transform_indices = @transform_2, window_bounds = array<i64: 8, 128>}]} {
    %c0 = arith.constant 0 : index
    %c0_0 = arith.constant 0 : index
    %0 = vector.load %arg2[%c0, %c0_0] : memref<8x128xf32, #tpu.memory_space<vmem>>, vector<8x128xf32>
    %c0_1 = arith.constant 0 : index
    %c0_2 = arith.constant 0 : index
    %1 = vector.load %arg1[%c0_1, %c0_2] : memref<1x128xf32, #tpu.memory_space<vmem>>, vector<1x128xf32>
    %2 = arith.mulf %0, %0 : vector<8x128xf32>
    %cst = arith.constant dense<0.000000e+00> : vector<8xf32>
    %3 = vector.multi_reduction <add>, %2, %cst [1] : vector<8x128xf32> to vector<8xf32>
    %4 = vector.shape_cast %3 : vector<8xf32> to vector<8x1xf32>
    %cst_3 = arith.constant 3.125000e-02 : f32
    %5 = vector.broadcast %cst_3 : f32 to vector<8x1xf32>
    %6 = arith.mulf %4, %5 : vector<8x1xf32>
    %cst_4 = arith.constant 9.99999997E-7 : f32
    %7 = vector.broadcast %cst_4 : f32 to vector<8x1xf32>
    %8 = arith.addf %6, %7 : vector<8x1xf32>
    %9 = math.rsqrt %8 : vector<8x1xf32>
    %10 = vector.broadcast %9 : vector<8x1xf32> to vector<8x128xf32>
    %11 = arith.mulf %0, %10 : vector<8x128xf32>
    %12 = vector.broadcast %1 : vector<1x128xf32> to vector<8x128xf32>
    %13 = arith.mulf %11, %12 : vector<8x128xf32>
    %c0_5 = arith.constant 0 : index
    %c0_6 = arith.constant 0 : index
    %14 = vector.load %arg3[%c0_5, %c0_6] : memref<8x128xf32, #tpu.memory_space<vmem>>, vector<8x128xf32>
    tpu.vector_store %arg3[%c0_5, %c0_6], %13 {strides = array<i32>} : memref<8x128xf32, #tpu.memory_space<vmem>>, vector<8x128xf32>,
    return
  }
  func.func @transform_0(%arg0: i32) -> (i32, i32) {
    %c0_i32 = arith.constant 0 : i32
    %c0_i32_0 = arith.constant 0 : i32
    %c0_i32_1 = arith.constant 0 : i32
    return %c0_i32, %c0_i32_0 : i32, i32
  }
  func.func @transform_1(%arg0: i32) -> (i32, i32) {
    %c0_i32 = arith.constant 0 : i32
    %c0_i32_0 = arith.constant 0 : i32
    return %arg0, %c0_i32 : i32, i32
  }
  func.func @transform_2(%arg0: i32) -> (i32, i32) {
    %c0_i32 = arith.constant 0 : i32
    %c0_i32_0 = arith.constant 0 : i32
    return %arg0, %c0_i32 : i32, i32
  }
}

</mosaic_0001>

<bundles_post_ra>
// kernel: tpu_custom_call.1
= control target key start
LH: loop header
LB: loop body
LE: loop exit
PB: predicated region body
PF: predicated region fallthrough
CT: control target
= control target key end

     0   :  { %7 = vsyncpa [#allocation3], 0  ;;  %s657_s0 = inlined_call_operand.hbm [shape: f32[1,128], index: 0, kind: input, shape index: {}]   ;;  %s658_s1 = inlined_call_operand.hbm [shape: f32[16,128], index: 1, kind: input, shape index: {}]   ;;  %s659_s2 = inlined_call_operand.hbm [shape: f32[16,128], index: 2, kind: output, shape index: {}]  }
   0x1   :  { %8 = vsyncpa [#allocation6], 0 }
   0x2   :  { %10 = vsyncpa [#allocation6 + $0x1], 0 }
   0x3   :  { %11 = vsyncpa [#allocation4], 0 }
   0x4   :  { %13 = vsyncpa [#allocation4 + $0x1], 0  ;;  %s519_s9 = smov 0   ;;  %s521_s10 = smov 0  }
   0x5   :  { %s523_s11 = smov 0   ;;  %s525_s12 = smov 0  }
   0x6 LB: > { %s540_s13 = sadd.s32 4294967295, %s501_s12   ;;  %s297_s14 = sadd.s32 4294967294, %s501_s12   ;;  %s501_s12 = sphi %s525_s12, %s669_s12   ;;  %s497_s11 = sphi %s523_s11, %s668_s11   ;;  %s493_s10 = sphi %s521_s10, %s667_s10   ;;  %s489_s9 = sphi %s519_s9, %s666_s9  }
   0x7   : > { %p60_p0 = scmp.ne.s32.totalorder %s493_s10, %s489_s9  ;;  %p61_p1 = scmp.eq.s32.totalorder %s540_s13, 0 }
   0x8   : > { %p84_p2 = scmp.eq.s32.totalorder %s540_s13, 1  ;;  %p90_p3 = scmp.eq.s32.totalorder %s297_s14, 1 }
   0x9   : > { %p549_p4 = por %p61_p1, %p60_p0  ;;  %p298_p5 = scmp.ge.s32.totalorder %s501_s12, 1 }
   0xa   : > { %p554_p6 = por %p90_p3, %p60_p0  ;;  %p97_p7 = scmp.lt.s32.totalorder %s501_s12, 3 }
   0xb   : > { %s109_s19 = sshll.u32 %s657_s0, 4  ;;  %s503_s21 = smov [#allocation2]   ;;  %s110_s19 = int_to_ptr.hbm [resolvable:$true] %s109_s19 }
   0xc   : > { %p562_p8 = pnand %p298_p5, %p97_p7  ;;  %s111_s22 = sshll.u32 %s503_s21, 4  ;;  %s112_s22 = int_to_ptr.vmem [resolvable:$true] %s111_s22 }
   0xd   : > { %s572_s23 = sadd.s32 1, %s501_s12   ;;  %s47_s24 = sadd.s32 1, %s497_s11 }
   0xe   : > { %p319_p10 = pneg %p562_p8  ;;  %s44_s25 = ssub.s32 %s501_s12, %s572_s23 }
   0xf   : > { %p45_p12 = scmp.eq.s32.totalorder %s44_s25, 0  ;;  %p54_p13 = scmp.ne.s32.totalorder %s497_s11, %s493_s10 }
  0x10   : > { %p320_p11 = pnand %p319_p10, %p61_p1  ;;  %p55_p0 = scmp.eq.s32.totalorder %s501_s12, 0 }
  0x11   : > { %s581_s26 = scalar_select %p45_p12, %s497_s11, %s47_s24  }
  0x12   : > { %322 = dma.hbm_to_vmem [thread:$0]  (!%p320_p11), %s110_s19, 16, %s112_s22, [#allocation3]  }
  0x13   : > { %p585_p3 = por %p84_p2, %p54_p13  ;;  %p332_p5 = scmp.lt.s32.totalorder %s501_s12, 2 }
  0x14   : > { %s122_s28 = sand.u32 1, %s497_s11   ;;  %s302_s29 = sshll.u32 %s501_s12, 3 }
  0x15   : > { %p56_p7 = por %p55_p0, %p54_p13  ;;  %s301_s30 = sshll.u32 %s122_s28, 3 }
  0x16   : > { %s130_s5 = scalar_lea.hbm %s658_s1, %s302_s29  ;;  %s126_s7 = scalar_lea.vmem [#allocation5], %s301_s30 }
  0x17   : > { %s132_s6 = sshll.u32 %s130_s5, 4  ;;  %s134_s8 = sshll.u32 %s126_s7, 4  ;;  %s133_s6 = int_to_ptr.hbm [resolvable:$true] %s132_s6  ;;  %s135_s8 = int_to_ptr.vmem [resolvable:$true] %s134_s8 }
  0x18   : > { %p595_p10 = pnand %p332_p5, %p56_p7  ;;  %s123_s17 = scalar_lea.sflag [#allocation6], %s122_s28 }
  0x19   : > { %s401_s18 = sshra.s32 %s133_s6, 4  ;;  %s408_s24 = scalar_lea.hbm %s658_s1, 16  ;;  %s402_s18 = int_to_ptr.hbm [resolvable:$true] %s401_s18 }
  0x1a   : > { %s403_s19 = scalar_lea.hbm %s402_s18, 8  ;;  %p405_p11 = pneg %p595_p10 }
  0x1b   : > { %p404_p2 = scmp.ne.s32.totalorder %s402_s18, %s403_s19  ;;  %p409_p0 = scmp.lt.s32.totalorder %s402_s18, %s658_s1 }
  0x1c   : > { %p410_p5 = scmp.lt.s32.totalorder %s408_s24, %s403_s19 }
  0x1d   : > { %p406_p12 = pnand %p405_p11, %p404_p2 }
  0x1e   : > { %p411_p7 = por %p410_p5, %p409_p0 }
  0x1f   : > { %p407_p13 = pneg %p406_p12 }
  0x21   : > { %p412_p9 = pnand %p411_p7, %p407_p13 }
  0x23   : > { %415 = shalt.err (!%p412_p9)
}
  0x24   : > { %326 = dma.hbm_to_vmem [thread:$0]  (!%p595_p10), %s133_s6, 128, %s135_s8, %s123_s17  }
  0x25   : > { %143 = sbr.rel (%p562_p8) target bundleno = 195 (0xc3), region = 28 }
  0x2a   : > { %476 = dma.done.wait (%p61_p1), [#allocation3], 16  }
  0x2b   : > { %478 = vsyncadd (%p61_p1), [#allocation3], 4294967280  ;;  %s616_s28 = sand.u32 1, %s493_s10  }
  0x2c   : > { %s305_s30 = sshll.u32 %s616_s28, 3  ;;  %s151_s3 = scalar_lea.sflag [#allocation6], %s616_s28 }
  0x2d   : > { %s154_s4 = scalar_lea.vmem [#allocation5], %s305_s30 }
  0x2e   : > { %480 = dma.done.wait (%p549_p4), %s151_s3, 128  }
  0x2f   : > { %482 = vsyncadd (%p549_p4), %s151_s3, 4294967168  ;;  %v176_v0 = vld [vmem:[%s154_s4] sm:$0xff]  ;;  %s308_s20 = sshll.u32 %s540_s13, 3  ;;  %v368_v11 = vld [vmem:[#allocation2] ss:$0 sm:$0xff]  ;;  %s175_s7 = scalar_lea.vmem [#allocation7], %s305_s30 }
  0x30   : > { %v178_v1 = vmul.f32 %v176_v0, %v176_v0  ;;  %s210_s15 = scalar_lea.hbm %s659_s2, %s308_s20  ;;  %s212_s8 = sshll.u32 %s175_s7, 4  ;;  %s213_s8 = int_to_ptr.vmem [resolvable:$true] %s212_s8 }
  0x31   : > { %s214_s14 = sshll.u32 %s210_s15, 4  ;;  %s200_s13 = scalar_lea.sflag [#allocation4], %s616_s28  ;;  %s215_s14 = int_to_ptr.hbm [resolvable:$true] %s214_s14 }
  0x32   : > { %179 = vadd.xlane.f32.xlu0 %v178_v1  ;;  %s445_s17 = sshra.s32 %s215_s14, 4  ;;  %s451_s22 = scalar_lea.hbm %s659_s2, 16  ;;  %s446_s17 = int_to_ptr.hbm [resolvable:$true] %s445_s17 }
  0x33   : > { %s447_s18 = scalar_lea.hbm %s446_s17, 8  ;;  %p452_p9 = scmp.lt.s32.totalorder %s446_s17, %s659_s2 }
  0x34   : > { %p448_p1 = scmp.ne.s32.totalorder %s446_s17, %s447_s18  ;;  %p453_p10 = scmp.lt.s32.totalorder %s451_s22, %s447_s18 }
  0x36   : > { %p449_p4 = pnand %p448_p1, %p585_p3  ;;  %p454_p2 = por %p453_p10, %p452_p9 }
  0x38   : > { %p450_p8 = pneg %p449_p4 }
  0x3a   : > { %p455_p11 = pnand %p454_p2, %p450_p8 }
  0xa5   : > { %v180_v2 = vpop.xlane.xlu0 %179 }
  0xa6   : > { %v181_v3 = vmul.f32 0.03125, %v180_v2 }
  0xa8   : > { %v182_v4 = vadd.f32 1e-06, %v181_v3 }
  0xaa   : > { %369 = vrsqrt.f32 %v182_v4  ;;  %vm189_vm1 = vweird.f32 %v182_v4 }
  0xb0   : > { %v370_v5 = vpop.eup %369 }
  0xb1   : > { %v184_v6 = vmul.f32 %v370_v5, %v182_v4  ;;  %vm190_vm0 = vweird.f32 %v370_v5 }
  0xb2   : > { %vm191_vm2 = vmor %vm189_vm1, %vm190_vm0 }
  0xb3   : > { %v185_v7 = vmul.f32 %v370_v5, %v184_v6 }
  0xb5   : > { %v186_v8 = vmul.f32 0.5, %v185_v7 }
  0xb7   : > { %v187_v9 = vsub.f32 1.5, %v186_v8 }
  0xb9   : > { %v188_v10 = vmul.f32 %v370_v5, %v187_v9 }
  0xbb   : > { %v192_v12 = vsel %vm191_vm2, %v370_v5, %v188_v10 }
  0xbc   : > { %v193_v13 = vmul.f32 %v192_v12, %v176_v0 }
  0xbe   : > { %v197_v14 = vmul.f32 %v368_v11, %v193_v13 }
  0xc0   : > { %198 = vst [vmem:[%s175_s7] sm:$0xff] %v197_v14 }
  0xc1   : > { %458 = shalt.err (!%p455_p11)
}
  0xc2   : > { %317 = dma.vmem_to_hbm [thread:$0]  (%p585_p3), %s213_s8, 128, %s215_s14, %s200_s13  }
  0xc3 PF: > { %s226_s29 = sand.u32 1, %s489_s9   ;;  %p665_p12 = scmp.ge.s32.totalorder %s501_s12, 2 }
  0xc4   : > { %s227_s28 = scalar_lea.sflag [#allocation4], %s226_s29 }
  0xc5   : > { %p328_p13 = pnand %p665_p12, %p554_p6 }
  0xc7   : > { %p329_p0 = pneg %p328_p13 }
  0xc9   : > { %484 = dma.done.wait (%p329_p0), %s227_s28, 128  }
  0xca   : > { %486 = vsyncadd (%p329_p0), %s227_s28, 4294967168  ;;  %p16_p5 = scmp.ge.s32.totalorder %s572_s23, 4   ;;  %s666_s9 = smov %s493_s10 }
  0xcb   : > { %s667_s10 = smov %s497_s11  ;;  %s668_s11 = smov %s581_s26 }
  0xcc   : > { %s669_s12 = smov %s572_s23  ;;  %18 = sbr.rel (!%p16_p5) target bundleno = 6 (0x6), region = 78 }
  0xd1   :  { %233 = vsyncpa [#allocation3], 1 }
  0xd2   :  { %235 = vsyncpa [#allocation3 + $0x1], 1 }
  0xd3   :  { %236 = vsyncpa [#allocation6], 1 }
  0xd4   :  { %238 = vsyncpa [#allocation6 + $0x1], 1 }
  0xd5   :  { %239 = vsyncpa [#allocation4], 1 }
  0xd6   :  { %241 = vsyncpa [#allocation4 + $0x1], 1 }

</bundles_post_ra>
